<compile_context>
chip_gen: v5e
topology: v5e:2x2
jax: 0.10.0
libtpu: 0.0.40
codegen_flags: <defaults>
</compile_context>

<pallas_src>
import functools

import jax
import jax.numpy as jnp
from jax.experimental import pallas as pl
from jax.experimental.pallas import tpu as pltpu

_LANE = 128
_SUB = 16  # batch-tile multiple (bf16 sublane packing for intermediates)


def _round_up(n, m):
    return ((n + m - 1) // m) * m


def _pad2d(a, rows, cols, dtype):
    """Zero-pad a 2-D array to (rows, cols) and cast to dtype."""
    out = jnp.zeros((rows, cols), dtype)
    return out.at[: a.shape[0], : a.shape[1]].set(a.astype(dtype))


def _mlp_kernel(x_ref, w1_ref, b1_ref, w2_ref, b2_ref, w3_ref, b3_ref, o_ref):
    # fc1 + ReLU: cast the streamed f32 activations to bf16 for the MXU;
    # accumulate / bias-add / ReLU in f32 (v5e-safe), then pack to bf16.
    x = x_ref[...].astype(jnp.bfloat16)
    h1 = jnp.dot(x, w1_ref[...], preferred_element_type=jnp.float32)
    h1 = jnp.maximum(h1 + b1_ref[...], 0.0).astype(jnp.bfloat16)
    # fc2 + ReLU
    h2 = jnp.dot(h1, w2_ref[...], preferred_element_type=jnp.float32)
    h2 = jnp.maximum(h2 + b2_ref[...], 0.0).astype(jnp.bfloat16)
    # fc3: logits at true num_classes width — masked vst, but far fewer HBM
    # bytes than a 128-lane padded store (this kernel is memory-bound).
    out = jnp.dot(h2, w3_ref[...], preferred_element_type=jnp.float32) + b3_ref[...]
    o_ref[...] = out.astype(o_ref.dtype)


@functools.partial(jax.jit, static_argnames=("tile_b",))
def crop_classifier_forward(x, params, *, tile_b=1024):
    """x: (B, input_size) float32.  params: w1,b1,w2,b2,w3,b3 with weights (in, out)."""
    w1, b1 = params["w1"], params["b1"]
    w2, b2 = params["w2"], params["b2"]
    w3, b3 = params["w3"], params["b3"]

    B, F = x.shape
    H1, H2, C = w1.shape[1], w2.shape[1], w3.shape[1]
    H1p, H2p = _round_up(H1, _LANE), _round_up(H2, _LANE)

    # Batch tile: multiple of 16, capped at tile_b, and capped at ceil(B/2) so
    # the grid keeps >= 2 parallel steps (v7x megacore uses both TensorCores).
    tb = max(_SUB, min(tile_b, _round_up(-(-B // 2), _SUB)))
    B_pad = _round_up(B, tb)
    grid = (B_pad // tb,)

    # x stays f32; only batch-pad.  The bf16 cast is fused into the kernel, so
    # no extra HBM round trip for a padded bf16 copy of the activations.
    x_p = x if B_pad == B else jnp.pad(x, ((0, B_pad - B), (0, 0)))

    # Weights: bf16 MXU operands; hidden dims zero-padded to 128 lanes so the
    # intermediates are full vregs.  Final layer keeps its true output width.
    w1p = _pad2d(w1, F, H1p, jnp.bfloat16)
    w2p = _pad2d(w2, H1p, H2p, jnp.bfloat16)
    w3p = _pad2d(w3, H2p, C, jnp.bfloat16)
    # Biases stay f32 (added to the f32 accumulator).
    b1p = _pad2d(b1.reshape(1, -1), 1, H1p, jnp.float32)
    b2p = _pad2d(b2.reshape(1, -1), 1, H2p, jnp.float32)
    b3p = b3.reshape(1, -1).astype(jnp.float32)

    resident = lambda a: pl.BlockSpec(a.shape, lambda i: (0, 0))

    # Advisory cost estimate using real (unpadded) work.
    flops = 2 * B * (F * H1 + H1 * H2 + H2 * C)
    bytes_accessed = (
        x_p.size * 4
        + (w1p.size + w2p.size + w3p.size) * 2
        + (b1p.size + b2p.size + b3p.size) * 4
        + B_pad * C * 4
    )

    out = pl.pallas_call(
        _mlp_kernel,
        out_shape=jax.ShapeDtypeStruct((B_pad, C), jnp.float32),
        grid=grid,
        in_specs=[
            pl.BlockSpec((tb, F), lambda i: (i, 0)),   # x: streamed per batch tile
            resident(w1p), resident(b1p),              # weights/biases: VMEM-resident
            resident(w2p), resident(b2p),
            resident(w3p), resident(b3p),
        ],
        out_specs=pl.BlockSpec((tb, C), lambda i: (i, 0)),  # narrow, true-width logits
        compiler_params=pltpu.CompilerParams(
            dimension_semantics=("parallel",),
            vmem_limit_bytes=32 * 1024 * 1024,
        ),
        cost_estimate=pl.CostEstimate(
            flops=flops, transcendentals=0, bytes_accessed=bytes_accessed
        ),
    )(x_p, w1p, b1p, w2p, b2p, w3p, b3p)

    return out[:B, :]


def init_params(key, input_size, num_classes):
    """Deterministic init mimicking nn.Linear's U(-1/sqrt(fan_in), +1/sqrt(fan_in))."""
    dims = [(input_size, 64), (64, 32), (32, num_classes)]
    params = {}
    for i, (fan_in, fan_out) in enumerate(dims, start=1):
        key, kw, kb = jax.random.split(key, 3)
        bound = 1.0 / jnp.sqrt(fan_in)
        # Stored as (in, out) == transpose of torch's (out, in) weight.
        params[f"w{i}"] = jax.random.uniform(
            kw, (fan_in, fan_out), jnp.float32, -bound, bound
        )
        params[f"b{i}"] = jax.random.uniform(
            kb, (1, fan_out), jnp.float32, -bound, bound
        )
    return params


if __name__ == "__main__":
    key = jax.random.PRNGKey(0)
    batch = 8
    input_size = 16
    num_classes = 4

    kx, kp = jax.random.split(key)
    x = jax.random.normal(kx, (batch, input_size), jnp.float32)
    params = init_params(kp, input_size, num_classes)

    out = crop_classifier_forward(x, params)
    jax.block_until_ready(out)
    assert out.shape == (batch, num_classes)

    # Reference in plain JAX with the same bf16 operand rounding the kernel
    # applies (accumulation / bias / ReLU in f32) -> only summation-order noise.
    def _bf(a):
        return a.astype(jnp.bfloat16).astype(jnp.float32)

    h = jnp.maximum(_bf(x) @ _bf(params["w1"]) + params["b1"], 0.0)
    h = jnp.maximum(_bf(h) @ _bf(params["w2"]) + params["b2"], 0.0)
    ref = _bf(h) @ _bf(params["w3"]) + params["b3"]
    assert jnp.allclose(out, ref, atol=1e-3, rtol=1e-3)

    # Loose sanity check against the pure-f32 math of the PyTorch module.
    h32 = jnp.maximum(x @ params["w1"] + params["b1"], 0.0)
    h32 = jnp.maximum(h32 @ params["w2"] + params["b2"], 0.0)
    ref32 = h32 @ params["w3"] + params["b3"]
    assert jnp.allclose(out, ref32, atol=5e-2, rtol=5e-2)

    print("KERNEL_OK")
</pallas_src>

<mosaic_0001>
module attributes {stable_mosaic.version = 11 : i64} {
  func.func @_mlp_kernel(%arg0: i32, %arg1: memref<16x16xf32, #tpu.memory_space<vmem>>, %arg2: memref<16x128xbf16, #tpu.memory_space<vmem>>, %arg3: memref<1x128xf32, #tpu.memory_space<vmem>>, %arg4: memref<128x128xbf16, #tpu.memory_space<vmem>>, %arg5: memref<1x128xf32, #tpu.memory_space<vmem>>, %arg6: memref<128x4xbf16, #tpu.memory_space<vmem>>, %arg7: memref<1x4xf32, #tpu.memory_space<vmem>>, %arg8: memref<16x4xf32, #tpu.memory_space<vmem>>) attributes {dimension_semantics = [#tpu.dimension_semantics<parallel>], iteration_bounds = array<i64: 1>, scalar_prefetch = 0 : i64, scratch_operands = 0 : i64, tpu.core_type = #tpu.core_type<tc>, window_params = [{transform_indices = @transform_0, window_bounds = array<i64: 16, 16>}, {pipeline_mode = #tpu.pipeline_mode<synchronous>, transform_indices = @transform_1, window_bounds = array<i64: 16, 128>}, {pipeline_mode = #tpu.pipeline_mode<synchronous>, transform_indices = @transform_2, window_bounds = array<i64: 1, 128>}, {pipeline_mode = #tpu.pipeline_mode<synchronous>, transform_indices = @transform_3, window_bounds = array<i64: 128, 128>}, {pipeline_mode = #tpu.pipeline_mode<synchronous>, transform_indices = @transform_4, window_bounds = array<i64: 1, 128>}, {pipeline_mode = #tpu.pipeline_mode<synchronous>, transform_indices = @transform_5, window_bounds = array<i64: 128, 4>}, {pipeline_mode = #tpu.pipeline_mode<synchronous>, transform_indices = @transform_6, window_bounds = array<i64: 1, 4>}, {transform_indices = @transform_7, window_bounds = array<i64: 16, 4>}]} {
    %c0 = arith.constant 0 : index
    %c0_0 = arith.constant 0 : index
    %0 = vector.load %arg1[%c0, %c0_0] : memref<16x16xf32, #tpu.memory_space<vmem>>, vector<16x16xf32>
    %1 = arith.truncf %0 : vector<16x16xf32> to vector<16x16xbf16>
    %c0_1 = arith.constant 0 : index
    %c0_2 = arith.constant 0 : index
    %2 = vector.load %arg2[%c0_1, %c0_2] : memref<16x128xbf16, #tpu.memory_space<vmem>>, vector<16x128xbf16>
    %cst = arith.constant dense<0.000000e+00> : vector<16x128xf32>
    %3 = tpu.matmul %1, %2, %cst {dimension_numbers = #tpu.dot_dimension_numbers<[1], [0], [0], [1], [0, 0, 1, 1], [], []>} : vector<16x16xbf16>, vector<16x128xbf16>, vector<16x128xf32> -> vector<16x128xf32>
    %c0_3 = arith.constant 0 : index
    %c0_4 = arith.constant 0 : index
    %4 = vector.load %arg3[%c0_3, %c0_4] : memref<1x128xf32, #tpu.memory_space<vmem>>, vector<1x128xf32>
    %5 = vector.broadcast %4 : vector<1x128xf32> to vector<16x128xf32>
    %6 = arith.addf %3, %5 : vector<16x128xf32>
    %cst_5 = arith.constant 0.000000e+00 : f32
    %7 = vector.broadcast %cst_5 : f32 to vector<16x128xf32>
    %8 = arith.maximumf %6, %7 : vector<16x128xf32>
    %9 = arith.truncf %8 : vector<16x128xf32> to vector<16x128xbf16>
    %c0_6 = arith.constant 0 : index
    %c0_7 = arith.constant 0 : index
    %10 = vector.load %arg4[%c0_6, %c0_7] : memref<128x128xbf16, #tpu.memory_space<vmem>>, vector<128x128xbf16>
    %cst_8 = arith.constant dense<0.000000e+00> : vector<16x128xf32>
    %11 = tpu.matmul %9, %10, %cst_8 {dimension_numbers = #tpu.dot_dimension_numbers<[1], [0], [0], [1], [0, 0, 1, 1], [], []>} : vector<16x128xbf16>, vector<128x128xbf16>, vector<16x128xf32> -> vector<16x128xf32>
    %c0_9 = arith.constant 0 : index
    %c0_10 = arith.constant 0 : index
    %12 = vector.load %arg5[%c0_9, %c0_10] : memref<1x128xf32, #tpu.memory_space<vmem>>, vector<1x128xf32>
    %13 = vector.broadcast %12 : vector<1x128xf32> to vector<16x128xf32>
    %14 = arith.addf %11, %13 : vector<16x128xf32>
    %cst_11 = arith.constant 0.000000e+00 : f32
    %15 = vector.broadcast %cst_11 : f32 to vector<16x128xf32>
    %16 = arith.maximumf %14, %15 : vector<16x128xf32>
    %17 = arith.truncf %16 : vector<16x128xf32> to vector<16x128xbf16>
    %c0_12 = arith.constant 0 : index
    %c0_13 = arith.constant 0 : index
    %18 = vector.load %arg6[%c0_12, %c0_13] : memref<128x4xbf16, #tpu.memory_space<vmem>>, vector<128x4xbf16>
    %cst_14 = arith.constant dense<0.000000e+00> : vector<16x4xf32>
    %19 = tpu.matmul %17, %18, %cst_14 {dimension_numbers = #tpu.dot_dimension_numbers<[1], [0], [0], [1], [0, 0, 1, 1], [], []>} : vector<16x128xbf16>, vector<128x4xbf16>, vector<16x4xf32> -> vector<16x4xf32>
    %c0_15 = arith.constant 0 : index
    %c0_16 = arith.constant 0 : index
    %20 = vector.load %arg7[%c0_15, %c0_16] : memref<1x4xf32, #tpu.memory_space<vmem>>, vector<1x4xf32>
    %21 = vector.broadcast %20 : vector<1x4xf32> to vector<16x4xf32>
    %22 = arith.addf %19, %21 : vector<16x4xf32>
    %c0_17 = arith.constant 0 : index
    %c0_18 = arith.constant 0 : index
    %23 = vector.load %arg8[%c0_17, %c0_18] : memref<16x4xf32, #tpu.memory_space<vmem>>, vector<16x4xf32>
    tpu.vector_store %arg8[%c0_17, %c0_18], %22 {strides = array<i32>} : memref<16x4xf32, #tpu.memory_space<vmem>>, vector<16x4xf32>,
    return
  }
  func.func @transform_0(%arg0: i32) -> (i32, i32) {
    %c0_i32 = arith.constant 0 : i32
    %c0_i32_0 = arith.constant 0 : i32
    return %arg0, %c0_i32 : i32, i32
  }
  func.func @transform_1(%arg0: i32) -> (i32, i32) {
    %c0_i32 = arith.constant 0 : i32
    %c0_i32_0 = arith.constant 0 : i32
    %c0_i32_1 = arith.constant 0 : i32
    return %c0_i32, %c0_i32_0 : i32, i32
  }
  func.func @transform_2(%arg0: i32) -> (i32, i32) {
    %c0_i32 = arith.constant 0 : i32
    %c0_i32_0 = arith.constant 0 : i32
    %c0_i32_1 = arith.constant 0 : i32
    return %c0_i32, %c0_i32_0 : i32, i32
  }
  func.func @transform_3(%arg0: i32) -> (i32, i32) {
    %c0_i32 = arith.constant 0 : i32
    %c0_i32_0 = arith.constant 0 : i32
    %c0_i32_1 = arith.constant 0 : i32
    return %c0_i32, %c0_i32_0 : i32, i32
  }
  func.func @transform_4(%arg0: i32) -> (i32, i32) {
    %c0_i32 = arith.constant 0 : i32
    %c0_i32_0 = arith.constant 0 : i32
    %c0_i32_1 = arith.constant 0 : i32
    return %c0_i32, %c0_i32_0 : i32, i32
  }
  func.func @transform_5(%arg0: i32) -> (i32, i32) {
    %c0_i32 = arith.constant 0 : i32
    %c0_i32_0 = arith.constant 0 : i32
    %c0_i32_1 = arith.constant 0 : i32
    return %c0_i32, %c0_i32_0 : i32, i32
  }
  func.func @transform_6(%arg0: i32) -> (i32, i32) {
    %c0_i32 = arith.constant 0 : i32
    %c0_i32_0 = arith.constant 0 : i32
    %c0_i32_1 = arith.constant 0 : i32
    return %c0_i32, %c0_i32_0 : i32, i32
  }
  func.func @transform_7(%arg0: i32) -> (i32, i32) {
    %c0_i32 = arith.constant 0 : i32
    %c0_i32_0 = arith.constant 0 : i32
    return %arg0, %c0_i32 : i32, i32
  }
}

</mosaic_0001>

<bundles_post_ra>
// kernel: crop_classifier_forward.1
= control target key start
LH: loop header
LB: loop body
LE: loop exit
PB: predicated region body
PF: predicated region fallthrough
CT: control target
= control target key end

     0   :  { %vm42_vm0 = vcmask 130048   ;;  %vm230_vm1 = vcmask 31744   ;;  %s438_s1 = inlined_call_operand.vmem [shape: bf16[16,128], index: 1, kind: input, shape index: {}]   ;;  %s439_s0 = inlined_call_operand.vmem [shape: f32[16,16], index: 0, kind: input, shape index: {}]   ;;  %s440_s3 = inlined_call_operand.vmem [shape: bf16[128,128], index: 3, kind: input, shape index: {}]   ;;  %s441_s2 = inlined_call_operand.vmem [shape: f32[1,128], index: 2, kind: input, shape index: {}]   ;;  %s442_s4 = inlined_call_operand.vmem [shape: f32[1,128], index: 4, kind: input, shape index: {}]   ;;  %s443_s5 = inlined_call_operand.vmem [shape: bf16[128,4], index: 5, kind: input, shape index: {}]   ;;  %s444_s6 = inlined_call_operand.vmem [shape: f32[1,4], index: 6, kind: input, shape index: {}]   ;;  %s445_s7 = inlined_call_operand.vmem [shape: f32[16,4], index: 7, kind: output, shape index: {}]  }
   0x1   :  { %v306_v0 = vld [vmem:[%s438_s1] sm:$0xff]  ;;  %v28_v2 = vld [vmem:[%s439_s0 + $0x8] sm:$0xff]  ;;  %v314_v4 = vld [vmem:[%s440_s3 + $0x38] sm:$0xff] }
   0x2   :  { %v27_v1 = vld [vmem:[%s439_s0] sm:$0xff]  ;;  %53 = vmatpush.bf16.msra.mxu0 %v306_v0  ;;  %131 = vmatpush.bf16.msra.mxu1 %v314_v4  ;;  %v313_v5 = vld [vmem:[%s440_s3 + $0x30] sm:$0xff]  ;;  %v312_v6 = vld [vmem:[%s440_s3 + $0x28] sm:$0xff] }
   0x3   :  { %v29_v3 = vpack.c.bf16 %v28_v2, %v27_v1  ;;  %v311_v7 = vld [vmem:[%s440_s3 + $0x20] sm:$0xff]  ;;  %v310_v8 = vld [vmem:[%s440_s3 + $0x18] sm:$0xff]  ;;  %v309_v9 = vld [vmem:[%s440_s3 + $0x10] sm:$0xff] }
   0x4   :  { %v308_v10 = vld [vmem:[%s440_s3 + $0x8] sm:$0xff]  ;;  %v307_v11 = vld [vmem:[%s440_s3] sm:$0xff]  ;;  %v322_v12 = vld [vmem:[%s443_s5 + $0x38] sm:$0xff] }
   0x5   :  { %241 = vmatmul.msk.bf16.vlgmr.msra.gmra.mxu0 %vm42_vm0, %v29_v3  ;;  %216 = vmatpush.bf16.msra.mxu2 %v322_v12  ;;  %v321_v13 = vld [vmem:[%s443_s5 + $0x30] sm:$0xff]  ;;  %v320_v14 = vld [vmem:[%s443_s5 + $0x28] sm:$0xff]  ;;  %v319_v15 = vld [vmem:[%s443_s5 + $0x20] sm:$0xff] }
   0x6   :  { %132 = vmatpush.bf16.msra.mxu1 %v313_v5  ;;  %v323_v17 = vld [vmem:[%s441_s2] ss:$0 sm:$0xff]  ;;  %v318_v24 = vld [vmem:[%s443_s5 + $0x18] sm:$0xff]  ;;  %v317_v25 = vld [vmem:[%s443_s5 + $0x10] sm:$0xff] }
   0x7   :  { %v316_v26 = vld [vmem:[%s443_s5 + $0x8] sm:$0xff]  ;;  %v315_v27 = vld [vmem:[%s443_s5] sm:$0xff] }
   0x8   :  { %v324_v29 = vld [vmem:[%s442_s4] ss:$0 sm:$0xff] }
   0x9   :  { %217 = vmatpush.bf16.msra.mxu2 %v321_v13  ;;  %v325_v36 = vld [vmem:[%s444_s6] ss:$0 sm:$0xff] }
   0xa   :  { %133 = vmatpush.bf16.msra.mxu1 %v312_v6 }
   0xd   :  { %218 = vmatpush.bf16.msra.mxu2 %v320_v14 }
   0xe   :  { %134 = vmatpush.bf16.msra.mxu1 %v311_v7 }
  0x11   :  { %219 = vmatpush.bf16.msra.mxu2 %v319_v15 }
  0x12   :  { %135 = vmatpush.bf16.msra.mxu1 %v310_v8 }
  0x15   :  { %220 = vmatpush.bf16.msra.mxu2 %v318_v24 }
  0x16   :  { %136 = vmatpush.bf16.msra.mxu1 %v309_v9 }
  0x19   :  { %221 = vmatpush.bf16.msra.mxu2 %v317_v25 }
  0x1a   :  { %137 = vmatpush.bf16.msra.mxu1 %v308_v10 }
  0x1d   :  { %222 = vmatpush.bf16.msra.mxu2 %v316_v26 }
  0x1e   :  { %138 = vmatpush.bf16.msra.mxu1 %v307_v11 }
  0x21   :  { %223 = vmatpush.bf16.msra.mxu2 %v315_v27 }
  0x82   :  { %v55_v16 = vpop.f32.mrf.mxu0 }
  0x83   :  { %v56_v18 = vadd.f32 %v323_v17, %v55_v16 }
  0x85   :  { %v60_v21 = vmax.f32 %v56_v18, 0.0 }
  0x8a   :  { %v57_v19 = vpop.f32.mrf.mxu0 }
  0x8b   :  { %v58_v20 = vadd.f32 %v323_v17, %v57_v19 }
  0x8d   :  { %v61_v22 = vmax.f32 %v58_v20, 0.0 }
  0x8f   :  { %v62_v23 = vpack.c.bf16 %v61_v22, %v60_v21 }
  0x91   :  { %139 = vmatmul.bf16.vlgmr.msra.gmra.mxu1 %v62_v23 }
 0x10e   :  { %v140_v28 = vpop.f32.mrf.mxu1 }
 0x10f   :  { %v141_v30 = vadd.f32 %v324_v29, %v140_v28 }
 0x111   :  { %v145_v33 = vmax.f32 %v141_v30, 0.0 }
 0x116   :  { %v142_v31 = vpop.f32.mrf.mxu1 }
 0x117   :  { %v143_v32 = vadd.f32 %v324_v29, %v142_v31 }
 0x119   :  { %v146_v34 = vmax.f32 %v143_v32, 0.0 }
 0x11b   :  { %v147_v35 = vpack.c.bf16 %v146_v34, %v145_v33 }
 0x11d   :  { %224 = vmatmul.bf16.vlgmr.msra.gmra.mxu2 %v147_v35 }
 0x1a0   :  { %v225_v37 = vpop.f32.mrf.mxu2 }
 0x1a1   :  { %v226_v38 = vadd.f32 %v325_v36, %v225_v37 }
 0x1a3   :  { %231 = vst.msk [vmem:[%s445_s7] sm:$0xff] %vm230_vm1, %v226_v38 }
 0x1a8   :  { %v227_v39 = vpop.f32.mrf.mxu2 }
 0x1a9   :  { %v228_v40 = vadd.f32 %v325_v36, %v227_v39 }
 0x1ab   :  { %232 = vst.msk [vmem:[%s445_s7 + $0x8] sm:$0xff] %vm230_vm1, %v228_v40 }

</bundles_post_ra>
